<compile_context>
chip_gen: v7x
topology: tpu7x:2x2x1
jax: 0.10.0
libtpu: 0.0.40
codegen_flags: <defaults>
</compile_context>

<pallas_src>
import functools

import jax
import jax.numpy as jnp
from jax.experimental import pallas as pl
from jax.experimental.pallas import tpu as pltpu

IN_DIM = 1 * 28 * 28      # 784
IN_PAD = 896              # 784 rounded up to a multiple of 128
HID_DIM = 128
OUT_DIM = 10
OUT_PAD = 128             # lane-dense output width
NEG_BIG = -1e30           # "minus infinity" for padded logit columns (finite -> no NaN)


def _round_up(x, m):
    return (x + m - 1) // m * m


def fcnet_kernel(x_ref, w1_ref, b1_ref, w2_ref, b2_ref, o_ref):
    # fc1: bf16 (TB, 896) @ bf16 (896, 128) with f32 accumulation on the MXU.
    h = jnp.dot(x_ref[...], w1_ref[...], preferred_element_type=jnp.float32)
    # bias + ReLU in f32 on the VPU.
    h = jnp.maximum(h + b1_ref[...], 0.0)
    # fc2: bf16 (TB, 128) @ bf16 (128, 128-padded) with f32 accumulation.
    logits = jnp.dot(h.astype(jnp.bfloat16), w2_ref[...],
                     preferred_element_type=jnp.float32) + b2_ref[...]
    # Numerically stable log_softmax over the last axis (f32).
    # Padded columns carry bias = -1e30 -> exp underflows to 0, so the reduction
    # over 128 lanes equals the reduction over the 10 real classes.
    m = jnp.max(logits, axis=-1, keepdims=True)
    shifted = logits - m
    lse = jnp.log(jnp.sum(jnp.exp(shifted), axis=-1, keepdims=True))
    o_ref[...] = (shifted - lse).astype(o_ref.dtype)


@functools.partial(jax.jit, static_argnames=("tb",))
def fcnet_forward(x, w1, b1, w2, b2, *, tb=None):
    """x: (B, 784) f32; w1: (784,128); b1: (1,128); w2: (128,10); b2: (1,10).

    Returns (B, 10) f32 log-probabilities, matching fcNet.forward.
    """
    B = x.shape[0]

    # Batch tile: 1024 rows is near the HBM roofline on all generations and fits
    # comfortably in scoped VMEM (v7x included) with double buffering.
    if tb is None:
        tb = 1024 if B >= 1024 else max(8, _round_up(B, 8))
    B_pad = _round_up(B, tb)

    # --- wrapper-side layout prep (pad + cast); single bf16 decision point ----
    x_p = jnp.pad(x, ((0, B_pad - B), (0, IN_PAD - IN_DIM))).astype(jnp.bfloat16)
    w1_p = jnp.pad(w1, ((0, IN_PAD - IN_DIM), (0, 0))).astype(jnp.bfloat16)
    w2_p = jnp.pad(w2, ((0, 0), (0, OUT_PAD - OUT_DIM))).astype(jnp.bfloat16)
    b1_f = b1.astype(jnp.float32)
    b2_p = jnp.pad(b2.astype(jnp.float32), ((0, 0), (0, OUT_PAD - OUT_DIM)),
                   constant_values=NEG_BIG)

    grid = (B_pad // tb,)

    # VMEM budget: double-buffered x/out tiles + resident weights + slack.
    weights_bytes = (IN_PAD * HID_DIM * 2 + HID_DIM * OUT_PAD * 2
                     + HID_DIM * 4 + OUT_PAD * 4)
    tile_bytes = 2 * (tb * IN_PAD * 2 + tb * OUT_PAD * 4)
    vmem_limit = int(min(48 << 20, weights_bytes + tile_bytes + (8 << 20)))

    cost = pl.CostEstimate(
        flops=2 * B_pad * (IN_PAD * HID_DIM + HID_DIM * OUT_PAD),
        transcendentals=B_pad * OUT_PAD,
        bytes_accessed=(B_pad * IN_PAD * 2 + weights_bytes + B_pad * OUT_PAD * 4),
    )

    out = pl.pallas_call(
        fcnet_kernel,
        out_shape=jax.ShapeDtypeStruct((B_pad, OUT_PAD), jnp.float32),
        grid=grid,
        in_specs=[
            pl.BlockSpec((tb, IN_PAD), lambda i: (i, 0)),        # x: tiled over batch
            pl.BlockSpec((IN_PAD, HID_DIM), lambda i: (0, 0)),   # w1: resident
            pl.BlockSpec((1, HID_DIM), lambda i: (0, 0)),        # b1: resident
            pl.BlockSpec((HID_DIM, OUT_PAD), lambda i: (0, 0)),  # w2: resident
            pl.BlockSpec((1, OUT_PAD), lambda i: (0, 0)),        # b2: resident
        ],
        out_specs=pl.BlockSpec((tb, OUT_PAD), lambda i: (i, 0)),
        compiler_params=pltpu.CompilerParams(
            dimension_semantics=("parallel",),
            vmem_limit_bytes=vmem_limit,
        ),
        cost_estimate=cost,
    )(x_p, w1_p, b1_f, w2_p, b2_p)

    # Strip batch and lane padding.
    return out[:B, :OUT_DIM]


def init_params(key):
    """Deterministic init mimicking PyTorch nn.Linear default:
    U(-1/sqrt(fan_in), 1/sqrt(fan_in)) for both weight and bias.
    Weights stored in (in, out) layout (== W.T of torch's (out, in))."""
    k1, k2, k3, k4 = jax.random.split(key, 4)
    bound1 = 1.0 / jnp.sqrt(jnp.float32(IN_DIM))
    bound2 = 1.0 / jnp.sqrt(jnp.float32(HID_DIM))
    w1 = jax.random.uniform(k1, (IN_DIM, HID_DIM), jnp.float32, -bound1, bound1)
    b1 = jax.random.uniform(k2, (1, HID_DIM), jnp.float32, -bound1, bound1)
    w2 = jax.random.uniform(k3, (HID_DIM, OUT_DIM), jnp.float32, -bound2, bound2)
    b2 = jax.random.uniform(k4, (1, OUT_DIM), jnp.float32, -bound2, bound2)
    return w1, b1, w2, b2


def _reference(x, w1, b1, w2, b2):
    h = jnp.maximum(x @ w1 + b1, 0.0)
    logits = h @ w2 + b2
    return jax.nn.log_softmax(logits, axis=-1)


if __name__ == "__main__":
    key = jax.random.PRNGKey(0)
    k_x, k_p = jax.random.split(key)

    B = 8  # small demo batch (multiple of 8 keeps the f32 sublane aligned)
    x = jax.random.normal(k_x, (B, IN_DIM), jnp.float32)
    w1, b1, w2, b2 = init_params(k_p)

    out = fcnet_forward(x, w1, b1, w2, b2)
    out = jax.block_until_ready(out)

    assert out.shape == (B, OUT_DIM)
    # log_softmax rows must exp-sum to ~1 (exact up to f32 rounding regardless of bf16 dots)
    row_sums = jnp.sum(jnp.exp(out), axis=1)
    assert bool(jnp.all(jnp.abs(row_sums - 1.0) < 1e-4))
    # loose agreement with a pure-JAX f32 reference (bf16 matmul inputs, f32 accumulation)
    ref = _reference(x, w1, b1, w2, b2)
    assert bool(jnp.max(jnp.abs(out - ref)) < 0.1)

    print("KERNEL_OK")
</pallas_src>

<mosaic_0001>
module attributes {stable_mosaic.version = 11 : i64} {
  func.func @fcnet_kernel(%arg0: i32, %arg1: memref<8x896xbf16, #tpu.memory_space<vmem>>, %arg2: memref<896x128xbf16, #tpu.memory_space<vmem>>, %arg3: memref<1x128xf32, #tpu.memory_space<vmem>>, %arg4: memref<128x128xbf16, #tpu.memory_space<vmem>>, %arg5: memref<1x128xf32, #tpu.memory_space<vmem>>, %arg6: memref<8x128xf32, #tpu.memory_space<vmem>>) attributes {dimension_semantics = [#tpu.dimension_semantics<parallel>], iteration_bounds = array<i64: 1>, scalar_prefetch = 0 : i64, scratch_operands = 0 : i64, tpu.core_type = #tpu.core_type<tc>, window_params = [{transform_indices = @transform_0, window_bounds = array<i64: 8, 896>}, {pipeline_mode = #tpu.pipeline_mode<synchronous>, transform_indices = @transform_1, window_bounds = array<i64: 896, 128>}, {pipeline_mode = #tpu.pipeline_mode<synchronous>, transform_indices = @transform_2, window_bounds = array<i64: 1, 128>}, {pipeline_mode = #tpu.pipeline_mode<synchronous>, transform_indices = @transform_3, window_bounds = array<i64: 128, 128>}, {pipeline_mode = #tpu.pipeline_mode<synchronous>, transform_indices = @transform_4, window_bounds = array<i64: 1, 128>}, {transform_indices = @transform_5, window_bounds = array<i64: 8, 128>}]} {
    %c0 = arith.constant 0 : index
    %c0_0 = arith.constant 0 : index
    %0 = vector.load %arg1[%c0, %c0_0] : memref<8x896xbf16, #tpu.memory_space<vmem>>, vector<8x896xbf16>
    %c0_1 = arith.constant 0 : index
    %c0_2 = arith.constant 0 : index
    %1 = vector.load %arg2[%c0_1, %c0_2] : memref<896x128xbf16, #tpu.memory_space<vmem>>, vector<896x128xbf16>
    %cst = arith.constant dense<0.000000e+00> : vector<8x128xf32>
    %2 = tpu.matmul %0, %1, %cst {dimension_numbers = #tpu.dot_dimension_numbers<[1], [0], [0], [1], [0, 0, 1, 1], [], []>} : vector<8x896xbf16>, vector<896x128xbf16>, vector<8x128xf32> -> vector<8x128xf32>
    %c0_3 = arith.constant 0 : index
    %c0_4 = arith.constant 0 : index
    %3 = vector.load %arg3[%c0_3, %c0_4] : memref<1x128xf32, #tpu.memory_space<vmem>>, vector<1x128xf32>
    %4 = vector.broadcast %3 : vector<1x128xf32> to vector<8x128xf32>
    %5 = arith.addf %2, %4 : vector<8x128xf32>
    %cst_5 = arith.constant 0.000000e+00 : f32
    %6 = vector.broadcast %cst_5 : f32 to vector<8x128xf32>
    %7 = arith.maximumf %5, %6 : vector<8x128xf32>
    %8 = arith.truncf %7 : vector<8x128xf32> to vector<8x128xbf16>
    %c0_6 = arith.constant 0 : index
    %c0_7 = arith.constant 0 : index
    %9 = vector.load %arg4[%c0_6, %c0_7] : memref<128x128xbf16, #tpu.memory_space<vmem>>, vector<128x128xbf16>
    %cst_8 = arith.constant dense<0.000000e+00> : vector<8x128xf32>
    %10 = tpu.matmul %8, %9, %cst_8 {dimension_numbers = #tpu.dot_dimension_numbers<[1], [0], [0], [1], [0, 0, 1, 1], [], []>} : vector<8x128xbf16>, vector<128x128xbf16>, vector<8x128xf32> -> vector<8x128xf32>
    %c0_9 = arith.constant 0 : index
    %c0_10 = arith.constant 0 : index
    %11 = vector.load %arg5[%c0_9, %c0_10] : memref<1x128xf32, #tpu.memory_space<vmem>>, vector<1x128xf32>
    %12 = vector.broadcast %11 : vector<1x128xf32> to vector<8x128xf32>
    %13 = arith.addf %10, %12 : vector<8x128xf32>
    %cst_11 = arith.constant dense<0xFF800000> : vector<8xf32>
    %14 = vector.multi_reduction <maximumf>, %13, %cst_11 [1] : vector<8x128xf32> to vector<8xf32>
    %15 = vector.shape_cast %14 : vector<8xf32> to vector<8x1xf32>
    %16 = vector.broadcast %15 : vector<8x1xf32> to vector<8x128xf32>
    %17 = arith.subf %13, %16 : vector<8x128xf32>
    %18 = math.exp %17 : vector<8x128xf32>
    %cst_12 = arith.constant dense<0.000000e+00> : vector<8xf32>
    %19 = vector.multi_reduction <add>, %18, %cst_12 [1] : vector<8x128xf32> to vector<8xf32>
    %20 = vector.shape_cast %19 : vector<8xf32> to vector<8x1xf32>
    %21 = math.log %20 : vector<8x1xf32>
    %22 = vector.broadcast %21 : vector<8x1xf32> to vector<8x128xf32>
    %23 = arith.subf %17, %22 : vector<8x128xf32>
    %c0_13 = arith.constant 0 : index
    %c0_14 = arith.constant 0 : index
    %24 = vector.load %arg6[%c0_13, %c0_14] : memref<8x128xf32, #tpu.memory_space<vmem>>, vector<8x128xf32>
    tpu.vector_store %arg6[%c0_13, %c0_14], %23 {strides = array<i32>} : memref<8x128xf32, #tpu.memory_space<vmem>>, vector<8x128xf32>,
    return
  }
  func.func @transform_0(%arg0: i32) -> (i32, i32) {
    %c0_i32 = arith.constant 0 : i32
    %c0_i32_0 = arith.constant 0 : i32
    return %arg0, %c0_i32 : i32, i32
  }
  func.func @transform_1(%arg0: i32) -> (i32, i32) {
    %c0_i32 = arith.constant 0 : i32
    %c0_i32_0 = arith.constant 0 : i32
    %c0_i32_1 = arith.constant 0 : i32
    return %c0_i32, %c0_i32_0 : i32, i32
  }
  func.func @transform_2(%arg0: i32) -> (i32, i32) {
    %c0_i32 = arith.constant 0 : i32
    %c0_i32_0 = arith.constant 0 : i32
    %c0_i32_1 = arith.constant 0 : i32
    return %c0_i32, %c0_i32_0 : i32, i32
  }
  func.func @transform_3(%arg0: i32) -> (i32, i32) {
    %c0_i32 = arith.constant 0 : i32
    %c0_i32_0 = arith.constant 0 : i32
    %c0_i32_1 = arith.constant 0 : i32
    return %c0_i32, %c0_i32_0 : i32, i32
  }
  func.func @transform_4(%arg0: i32) -> (i32, i32) {
    %c0_i32 = arith.constant 0 : i32
    %c0_i32_0 = arith.constant 0 : i32
    %c0_i32_1 = arith.constant 0 : i32
    return %c0_i32, %c0_i32_0 : i32, i32
  }
  func.func @transform_5(%arg0: i32) -> (i32, i32) {
    %c0_i32 = arith.constant 0 : i32
    %c0_i32_0 = arith.constant 0 : i32
    return %arg0, %c0_i32 : i32, i32
  }
}

</mosaic_0001>

<bundles_post_ra>
// kernel: fcnet_forward.1
= control target key start
LH: loop header
LB: loop body
LE: loop exit
PB: predicated region body
PF: predicated region fallthrough
CT: control target
= control target key end

     0   :  { %v1103_v42 = vmov 0.0   ;;  %vm1104_vm0 = vmmov 0   ;;  %s1378_s0 = inlined_call_operand.vmem [shape: bf16[8,896], index: 0, kind: input, shape index: {}]   ;;  %s1379_s1 = inlined_call_operand.vmem [shape: bf16[896,128], index: 1, kind: input, shape index: {}]   ;;  %s1380_s2 = inlined_call_operand.vmem [shape: f32[1,128], index: 2, kind: input, shape index: {}]   ;;  %s1381_s3 = inlined_call_operand.vmem [shape: bf16[128,128], index: 3, kind: input, shape index: {}]   ;;  %s1382_s4 = inlined_call_operand.vmem [shape: f32[1,128], index: 4, kind: input, shape index: {}]   ;;  %s1383_s5 = inlined_call_operand.hbm [shape: f32[8,128], index: 5, kind: output, shape index: {}]  }
   0x1   :  { %v1004_v0 = vld [vmem:[%s1379_s1 + $0x40] sm:$0xff]   ;;  %v1008_v4 = vld [vmem:[%s1379_s1 + $0x48] sm:$0xff]   ;;  %v1012_v8 = vld [vmem:[%s1379_s1 + $0x50] sm:$0xff]  }
   0x2   :  { %v1005_v1 = vld [vmem:[%s1379_s1] sm:$0xff]   ;;  %877 = vmatprep.subr.bf16.mxu0 %v1004_v0  ;;  %v1009_v5 = vld [vmem:[%s1379_s1 + $0x8] sm:$0xff]   ;;  %v1013_v9 = vld [vmem:[%s1379_s1 + $0x10] sm:$0xff]  }
   0x3   :  { %v1006_v2 = vld [vmem:[%s1379_s1 + $0xc0] sm:$0xff]   ;;  %878 = vmatpush3.bf16.msra.mxu0 %v1005_v1  ;;  %v1010_v6 = vld [vmem:[%s1379_s1 + $0xc8] sm:$0xff]   ;;  %v1014_v10 = vld [vmem:[%s1379_s1 + $0xd0] sm:$0xff]  }
   0x4   :  { %v1007_v3 = vld [vmem:[%s1379_s1 + $0x80] sm:$0xff]   ;;  %899 = vmatprep.subr.bf16.mxu1 %v1006_v2  ;;  %879 = vmatprep.subr.bf16.mxu0 %v1008_v4  ;;  %v1011_v7 = vld [vmem:[%s1379_s1 + $0x88] sm:$0xff]   ;;  %v1015_v11 = vld [vmem:[%s1379_s1 + $0x90] sm:$0xff]  }
   0x5   :  { %900 = vmatpush3.bf16.msra.mxu1 %v1007_v3  ;;  %v1016_v12 = vld [vmem:[%s1379_s1 + $0x58] sm:$0xff]   ;;  %v1020_v16 = vld [vmem:[%s1379_s1 + $0x60] sm:$0xff]   ;;  %v1024_v20 = vld [vmem:[%s1379_s1 + $0x68] sm:$0xff]  }
   0x6   :  { %901 = vmatprep.subr.bf16.mxu1 %v1010_v6  ;;  %v1017_v13 = vld [vmem:[%s1379_s1 + $0x18] sm:$0xff]   ;;  %v1021_v17 = vld [vmem:[%s1379_s1 + $0x20] sm:$0xff]   ;;  %v1025_v21 = vld [vmem:[%s1379_s1 + $0x28] sm:$0xff]  }
   0x7   :  { %880 = vmatpush3.bf16.msra.mxu0 %v1009_v5  ;;  %v1018_v14 = vld [vmem:[%s1379_s1 + $0xd8] sm:$0xff]   ;;  %v1022_v18 = vld [vmem:[%s1379_s1 + $0xe0] sm:$0xff]   ;;  %v1026_v22 = vld [vmem:[%s1379_s1 + $0xe8] sm:$0xff]  }
   0x8   :  { %881 = vmatprep.subr.bf16.mxu0 %v1012_v8  ;;  %v1019_v15 = vld [vmem:[%s1379_s1 + $0x98] sm:$0xff]   ;;  %v1023_v19 = vld [vmem:[%s1379_s1 + $0xa0] sm:$0xff]   ;;  %v1027_v23 = vld [vmem:[%s1379_s1 + $0xa8] sm:$0xff]  }
   0x9   :  { %902 = vmatpush3.bf16.msra.mxu1 %v1011_v7  ;;  %v1028_v24 = vld [vmem:[%s1379_s1 + $0x70] sm:$0xff]   ;;  %v1032_v28 = vld [vmem:[%s1379_s1 + $0x78] sm:$0xff]   ;;  %v22_v31 = vld [vmem:[%s1378_s0] sm:$0xff] }
   0xa   :  { %903 = vmatprep.subr.bf16.mxu1 %v1014_v10  ;;  %v1029_v25 = vld [vmem:[%s1379_s1 + $0x30] sm:$0xff]   ;;  %v1033_v29 = vld [vmem:[%s1379_s1 + $0x38] sm:$0xff]   ;;  %v805_v32 = vcombine.low %v22_v31, %v22_v31  ;;  %v806_v33 = vcombine.high %v22_v31, %v22_v31  ;;  %v1038_v35 = vld [vmem:[%s1379_s1 + $0x140] sm:$0xff]  }
   0xb   :  { %882 = vmatpush3.bf16.msra.mxu0 %v1013_v9  ;;  %v1030_v26 = vld [vmem:[%s1379_s1 + $0xf0] sm:$0xff]   ;;  %v1034_v30 = vld [vmem:[%s1379_s1 + $0xf8] sm:$0xff]   ;;  %v23_v36 = vld [vmem:[%s1378_s0 + $0x8] sm:$0xff] }
   0xc   :  { %883 = vmatprep.subr.bf16.mxu0 %v1016_v12  ;;  %v1031_v27 = vld [vmem:[%s1379_s1 + $0xb0] sm:$0xff]   ;;  %v1037_v34 = vld [vmem:[%s1379_s1 + $0xb8] sm:$0xff]   ;;  %538 = vmatprep.mubr.bf16.mxu0 %v806_v33  ;;  %v807_v37 = vcombine.low %v23_v36, %v23_v36  ;;  %v808_v38 = vcombine.high %v23_v36, %v23_v36  ;;  %v1041_v39 = vld [vmem:[%s1379_s1 + $0x100] sm:$0xff]  }
   0xd   :  { %904 = vmatpush3.bf16.msra.mxu1 %v1015_v11  ;;  %v1042_v40 = vld [vmem:[%s1379_s1 + $0x180] sm:$0xff]   ;;  %v1043_v41 = vld [vmem:[%s1379_s1 + $0x148] sm:$0xff]   ;;  %v1046_v45 = vld [vmem:[%s1379_s1 + $0x150] sm:$0xff]  }
   0xe   :  { %905 = vmatprep.subr.bf16.mxu1 %v1018_v14  ;;  %578 = vmatprep.mubr.bf16.mxu1 %v808_v38  ;;  %v1044_v43 = vld [vmem:[%s1379_s1 + $0x108] sm:$0xff]   ;;  %v1047_v46 = vld [vmem:[%s1379_s1 + $0x110] sm:$0xff]   ;;  %v1049_v48 = vld [vmem:[%s1379_s1 + $0x158] sm:$0xff]  }
   0xf   :  { %884 = vmatpush3.bf16.msra.mxu0 %v1017_v13  ;;  %v1045_v44 = vld [vmem:[%s1379_s1 + $0x188] sm:$0xff]   ;;  %v1048_v47 = vld [vmem:[%s1379_s1 + $0x190] sm:$0xff]   ;;  %v1050_v49 = vld [vmem:[%s1379_s1 + $0x118] sm:$0xff]  }
  0x10   :  { %885 = vmatprep.subr.bf16.mxu0 %v1020_v16  ;;  %v1052_v50 = vld [vmem:[%s1379_s1 + $0x160] sm:$0xff]   ;;  %v1051_v51 = vld [vmem:[%s1379_s1 + $0x198] sm:$0xff]   ;;  %v1055_v53 = vld [vmem:[%s1379_s1 + $0x168] sm:$0xff]  }
  0x11   :  { %906 = vmatpush3.bf16.msra.mxu1 %v1019_v15  ;;  %v1053_v52 = vld [vmem:[%s1379_s1 + $0x120] sm:$0xff]   ;;  %v1056_v55 = vld [vmem:[%s1379_s1 + $0x128] sm:$0xff]   ;;  %v1058_v56 = vld [vmem:[%s1379_s1 + $0x170] sm:$0xff]  }
  0x12   :  { %907 = vmatprep.subr.bf16.mxu1 %v1022_v18  ;;  %v1054_v54 = vld [vmem:[%s1379_s1 + $0x1a0] sm:$0xff]   ;;  %v1057_v57 = vld [vmem:[%s1379_s1 + $0x1a8] sm:$0xff]   ;;  %v1059_v58 = vld [vmem:[%s1379_s1 + $0x130] sm:$0xff]  }
  0x13   :  { %886 = vmatpush3.bf16.msra.mxu0 %v1021_v17  ;;  %v24_v59 = vld [vmem:[%s1378_s0 + $0x10] sm:$0xff]  ;;  %v1061_v62 = vld [vmem:[%s1379_s1 + $0x178] sm:$0xff]  }
  0x14   :  { %887 = vmatprep.subr.bf16.mxu0 %v1024_v20  ;;  %v1060_v60 = vld [vmem:[%s1379_s1 + $0x1b0] sm:$0xff]   ;;  %v810_v61 = vcombine.high %v24_v59, %v24_v59  ;;  %v1062_v63 = vld [vmem:[%s1379_s1 + $0x138] sm:$0xff]   ;;  %v809_v1 = vcombine.low %v24_v59, %v24_v59 }
  0x15   :  { %908 = vmatpush3.bf16.msra.mxu1 %v1023_v19  ;;  %v1065_v0 = vld [vmem:[%s1379_s1 + $0x1b8] sm:$0xff]  }
  0x16   :  { %909 = vmatprep.subr.bf16.mxu1 %v1026_v22 }
  0x17   :  { %888 = vmatpush3.bf16.msra.mxu0 %v1025_v21 }
  0x18   :  { %889 = vmatprep.subr.bf16.mxu0 %v1028_v24 }
  0x19   :  { %910 = vmatpush3.bf16.msra.mxu1 %v1027_v23 }
  0x1a   :  { %911 = vmatprep.subr.bf16.mxu1 %v1030_v26 }
  0x1b   :  { %890 = vmatpush3.bf16.msra.mxu0 %v1029_v25 }
  0x1c   :  { %891 = vmatprep.subr.bf16.mxu0 %v1032_v28 }
  0x1d   :  { %912 = vmatpush3.bf16.msra.mxu1 %v1031_v27 }
  0x1e   :  { %913 = vmatprep.subr.bf16.mxu1 %v1034_v30 }
  0x1f   :  { %892 = vmatpush3.bf16.msra.mxu0 %v1033_v29 }
  0x20   :  { %921 = vmatprep.subr.bf16.mxu0 %v1038_v35 }
  0x21   :  { %914 = vmatpush3.bf16.msra.mxu1 %v1037_v34 }
  0x22   :  { %539 = vmatmul.mubr.bf16.vlgmr.msra.gmra.mrb[0].mxu0 %v805_v32  ;;  %961 = vmatprep.subr.bf16.mxu1 %v1103_v42 }
  0x23   :  { %922 = vmatpush3.bf16.msra.mxu0 %v1041_v39  ;;  %618 = vmatprep.mubr.bf16.mxu0 %v810_v61 }
  0x24   :  { %579 = vmatmul.mubr.bf16.vlgmr.msra.gmra.mrb[0].mxu1 %v807_v37  ;;  %923 = vmatprep.subr.bf16.mxu0 %v1043_v41 }
  0x25   :  { %962 = vmatpush3.bf16.msra.mxu1 %v1042_v40  ;;  %977 = vmatprep.mubr.msk.bf16.mxu1 %vm1104_vm0, %v1103_v42 }
  0x26   :  { %963 = vmatprep.subr.bf16.mxu1 %v1103_v42 }
  0x27   :  { %924 = vmatpush3.bf16.msra.mxu0 %v1044_v43 }
  0x28   :  { %925 = vmatprep.subr.bf16.mxu0 %v1046_v45 }
  0x29   :  { %964 = vmatpush3.bf16.msra.mxu1 %v1045_v44 }
  0x2a   :  { %965 = vmatprep.subr.bf16.mxu1 %v1103_v42 }
  0x2b   :  { %926 = vmatpush3.bf16.msra.mxu0 %v1047_v46 }
  0x2c   :  { %927 = vmatprep.subr.bf16.mxu0 %v1049_v48 }
  0x2d   :  { %966 = vmatpush3.bf16.msra.mxu1 %v1048_v47 }
  0x2e   :  { %967 = vmatprep.subr.bf16.mxu1 %v1103_v42 }
  0x2f   :  { %928 = vmatpush3.bf16.msra.mxu0 %v1050_v49 }
  0x30   :  { %929 = vmatprep.subr.bf16.mxu0 %v1052_v50 }
  0x31   :  { %968 = vmatpush3.bf16.msra.mxu1 %v1051_v51 }
  0x32   :  { %969 = vmatprep.subr.bf16.mxu1 %v1103_v42 }
  0x33   :  { %930 = vmatpush3.bf16.msra.mxu0 %v1053_v52 }
  0x34   :  { %931 = vmatprep.subr.bf16.mxu0 %v1055_v53 }
  0x35   :  { %970 = vmatpush3.bf16.msra.mxu1 %v1054_v54 }
  0x36   :  { %971 = vmatprep.subr.bf16.mxu1 %v1103_v42 }
  0x37   :  { %932 = vmatpush3.bf16.msra.mxu0 %v1056_v55 }
  0x38   :  { %933 = vmatprep.subr.bf16.mxu0 %v1058_v56 }
  0x39   :  { %972 = vmatpush3.bf16.msra.mxu1 %v1057_v57 }
  0x3a   :  { %973 = vmatprep.subr.bf16.mxu1 %v1103_v42 }
  0x3b   :  { %934 = vmatpush3.bf16.msra.mxu0 %v1059_v58 }
  0x3c   :  { %935 = vmatprep.subr.bf16.mxu0 %v1061_v62 }
  0x3d   :  { %974 = vmatpush3.bf16.msra.mxu1 %v1060_v60 }
  0x3e   :  { %975 = vmatprep.subr.bf16.mxu1 %v1103_v42 }
  0x3f   :  { %10 = vsyncpa [#allocation3], 0  ;;  %936 = vmatpush3.bf16.msra.mxu0 %v1062_v63  ;;  %v1066_v2 = vld [vmem:[%s1378_s0 + $0x18] ss:$0 sps:$4 sm:$0xff]   ;;  %v1067_v3 = vld [vmem:[%s1381_s3] sm:$0xff]   ;;  %s1105_s29 = smov [#allocation2]  }
  0x40   :  { %981 = vmatprep.subr.bf16.mxu0 %v1103_v42  ;;  %v1068_v4 = vld [vmem:[%s1381_s3 + $0x8] sm:$0xff]   ;;  %v1069_v5 = vld [vmem:[%s1381_s3 + $0x10] sm:$0xff]   ;;  %v1070_v6 = vld [vmem:[%s1381_s3 + $0x18] sm:$0xff]   ;;  %s796_s30 = sshll.u32 %s1105_s29, 4  ;;  %s797_s30 = int_to_ptr.vmem [resolvable:$true] %s796_s30 }
  0x41   :  { %976 = vmatpush3.bf16.msra.mxu1 %v1065_v0  ;;  %v1071_v7 = vld [vmem:[%s1381_s3 + $0x20] sm:$0xff]   ;;  %v1072_v8 = vld [vmem:[%s1381_s3 + $0x28] sm:$0xff]   ;;  %v1073_v9 = vld [vmem:[%s1381_s3 + $0x30] sm:$0xff]   ;;  %p1084_p1 = scmp.lt.s32.totalorder %s797_s30, %s797_s30 }
  0x42   :  { %619 = vmatmul.mubr.bf16.vlgmr.msra.gmra.mrb[4].mxu0 %v809_v1  ;;  %v1074_v10 = vld [vmem:[%s1381_s3 + $0x38] sm:$0xff]   ;;  %v804_v12 = vld [vmem:[%s1380_s2] ss:$0 sm:$0xff] }
  0x43   :  { %997 = vmatprep.mubr.msk.bf16.mxu0 %vm1104_vm0, %v1103_v42  ;;  %982 = vmatpush3.bf16.msra.mxu0 %v1067_v3  ;;  %v868_v37 = vld [vmem:[%s1382_s4] ss:$0 sm:$0xff]  ;;  %s1079_s4 = scalar_lea.vmem %s797_s30, 128 }
  0x44   :  { %978 = vmatmul.mubr.bf16.vlgmr.msra.gmra.mrb[4].mxu1 %v1066_v2  ;;  %983 = vmatprep.subr.bf16.mxu0 %v1103_v42  ;;  %p1080_p0 = scmp.ne.s32.totalorder %s797_s30, %s1079_s4  ;;  %p1085_p2 = scmp.lt.s32.totalorder %s1079_s4, %s1079_s4 }
  0x46   :  { %p1086_p3 = por %p1085_p2, %p1084_p1 }
  0x47   :  { %984 = vmatpush3.bf16.msra.mxu0 %v1068_v4 }
  0x48   :  { %985 = vmatprep.subr.bf16.mxu0 %v1103_v42  ;;  %p1087_p4 = pnand %p1086_p3, %p1080_p0 }
  0x4b   :  { %986 = vmatpush3.bf16.msra.mxu0 %v1069_v5 }
  0x4c   :  { %987 = vmatprep.subr.bf16.mxu0 %v1103_v42 }
  0x4f   :  { %988 = vmatpush3.bf16.msra.mxu0 %v1070_v6 }
  0x50   :  { %989 = vmatprep.subr.bf16.mxu0 %v1103_v42 }
  0x53   :  { %990 = vmatpush3.bf16.msra.mxu0 %v1071_v7 }
  0x54   :  { %991 = vmatprep.subr.bf16.mxu0 %v1103_v42 }
  0x57   :  { %992 = vmatpush3.bf16.msra.mxu0 %v1072_v8 }
  0x58   :  { %993 = vmatprep.subr.bf16.mxu0 %v1103_v42 }
  0x5b   :  { %994 = vmatpush3.bf16.msra.mxu0 %v1073_v9 }
  0x5c   :  { %995 = vmatprep.subr.bf16.mxu0 %v1103_v42 }
  0x5f   :  { %996 = vmatpush3.bf16.msra.mxu0 %v1074_v10 }
  0xf5   :  { %v893_v11 = vpop.f32.mrb[0].mxu0 }
  0xf6   :  { %v894_v13 = vpop.f32.mrb[1].mxu0 }
  0xf7   :  { %v895_v14 = vadd.f32 %v894_v13, %v893_v11  ;;  %v896_v15 = vpop.f32.mrb[2].mxu0  ;;  %v915_v16 = vpop.f32.mrb[0].mxu1 }
  0xf8   :  { %v897_v17 = vpop.f32.mrb[3].mxu0  ;;  %v916_v18 = vpop.f32.mrb[1].mxu1 }
  0xf9   :  { %v541_v19 = vadd.f32 %v895_v14, %v804_v12  ;;  %v917_v20 = vadd.f32 %v916_v18, %v915_v16  ;;  %v918_v21 = vpop.f32.mrb[2].mxu1 }
  0xfa   :  { %v919_v22 = vpop.f32.mrb[3].mxu1 }
  0xfb   :  { %v581_v23 = vadd.f32 %v917_v20, %v541_v19 }
 0x115   :  { %v937_v24 = vpop.f32.mrb[4].mxu0 }
 0x116   :  { %v938_v25 = vpop.f32.mrb[5].mxu0 }
 0x117   :  { %v939_v26 = vadd.f32 %v938_v25, %v937_v24  ;;  %v940_v27 = vpop.f32.mrb[6].mxu0  ;;  %v660_v28 = vpop.f32.mrb[4].mxu1 }
 0x118   :  { %v941_v29 = vpop.f32.mrb[7].mxu0  ;;  %v979_v30 = vpop.f32.mrb[5].mxu1 }
 0x119   :  { %v621_v31 = vadd.f32 %v939_v26, %v581_v23  ;;  %v663_v32 = vpop.f32.mrb[6].mxu1 }
 0x11a   :  { %v980_v33 = vpop.f32.mrb[7].mxu1 }
 0x11b   :  { %v661_v34 = vadd.f32 %v660_v28, %v621_v31 }
 0x11d   :  { %v666_v35 = vmax.f32 %v661_v34, 0.0 }
 0x11f   :  { %v667_v36 = vpack.c.bf16 %v666_v35, %v666_v35 }
 0x121   :  { %998 = vmatmul.mubr.bf16.vlgmr.msra.gmra.mrb[8].mxu0 %v667_v36 }
 0x1f4   :  { %v773_v38 = vpop.f32.mrb[8].mxu0 }
 0x1f5   :  { %v774_v39 = vadd.f32 %v868_v37, %v773_v38  ;;  %v999_v40 = vpop.f32.mrb[9].mxu0 }
 0x1f6   :  { %v776_v41 = vpop.f32.mrb[10].mxu0 }
 0x1f7   :  { %779 = vmax.xlane.f32.xlu0 %v774_v39  ;;  %v1000_v42 = vpop.f32.mrb[11].mxu0 }
 0x284   :  { %v780_v43 = vpop.xlane.xlu0 %779 }
 0x285   :  { %v781_v44 = vsub.f32 %v774_v39, %v780_v43 }
 0x287   :  { %v782_v45 = vmul.f32 1.442695, %v781_v44 }
 0x289   :  { %1075 = vpow2.f32 %v782_v45 }
 0x293   :  { %v1076_v46 = vpop.eup %1075 }
 0x294   :  { %784 = vadd.xlane.f32.xlu0 %v1076_v46 }
 0x321   :  { %v785_v47 = vpop.xlane.xlu0 %784 }
 0x322   :  { %1077 = vlog2.f32 %v785_v47 }
 0x32c   :  { %v1078_v48 = vpop.eup %1077 }
 0x32d   :  { %v787_v49 = vmul.f32 0.6931472, %v1078_v48 }
 0x32f   :  { %v788_v50 = vsub.f32 %v781_v44, %v787_v49 }
 0x331   :  { %789 = vst [vmem:[#allocation2] sm:$0xff] %v788_v50 }
 0x332   :  { %1090 = shalt.err (!%p1087_p4)
}
 0x333   :  { %s1091_s8 = scalar_lea.hbm %s1383_s5, 128 }
 0x334   :  { %p1092_p5 = scmp.ne.s32.totalorder %s1383_s5, %s1091_s8  ;;  %p1095_p6 = scmp.lt.u32.totalorder %s1091_s8, %s1383_s5 }
 0x336   :  { %p1097_p7 = pnand %p1095_p6, %p1092_p5 }
 0x338   :  { %1100 = shalt.err (!%p1097_p7)
}
 0x339   :  { %799 = dma.vmem_to_hbm [thread:$0]  %s797_s30, 128, %s1383_s5, [#allocation3]  }
 0x33a   :  { %1101 = dma.done.wait [#allocation3], 128  }
 0x33b   :  { %1102 = vsyncadd [#allocation3], 4294967168 }
 0x33c   :  { %803 = vsyncpa [#allocation3], 1 }

</bundles_post_ra>
